<compile_context>
chip_gen: v6e
topology: v6e:2x2x1
jax: 0.10.0
libtpu: 0.0.40
codegen_flags: <defaults>
</compile_context>

<pallas_src>
import functools

import jax
import jax.numpy as jnp
from jax.experimental import pallas as pl
from jax.experimental.pallas import tpu as pltpu


def _layernorm_kernel(x_ref, alpha_ref, beta_ref, o_ref, *, eps, hidden):
    # x_ref: (block_rows, hidden); alpha/beta: (1, hidden), already f32.
    x = x_ref[...].astype(jnp.float32)

    # One-pass statistics over the lane axis: single sweep of the tile.
    s1 = jnp.sum(x, axis=-1, keepdims=True)
    s2 = jnp.sum(x * x, axis=-1, keepdims=True)
    mu = s1 * jnp.float32(1.0 / hidden)

    # Unbiased variance (ddof=1) to match torch.std's default.
    # s2 - s1*mu == s2 - hidden*mu^2; clamp guards tiny negative cancellation.
    var = jnp.maximum(s2 - s1 * mu, 0.0) * jnp.float32(1.0 / (hidden - 1))

    # Per-row reciprocal (block_rows x 1), then a broadcast multiply over the
    # tile.  Kept exact (no approx EUP recip) to preserve tight tolerances.
    inv = 1.0 / (jnp.sqrt(var) + jnp.float32(eps))

    o_ref[...] = ((x - mu) * inv * alpha_ref[...] + beta_ref[...]).astype(o_ref.dtype)


def _cdiv(a, b):
    return (a + b - 1) // b


def _round_up(n, m):
    return ((n + m - 1) // m) * m


def _vmem_capacity_bytes():
    """Best-effort query of per-core VMEM; falls back to the v7x (64 MiB) value."""
    try:
        return int(pltpu.get_tpu_info().vmem_capacity_bytes)
    except Exception:
        return 64 * 2**20


def _pick_block_rows(rows, hidden, itemsize, target_bytes):
    """Sublane-aligned row tile targeting ~target_bytes of native-dtype data,
    with a grid that is >= 2 blocks (and even when small) for megacore balance."""
    sublane = 16 if itemsize == 2 else 8  # bf16 packs 2 rows per sublane
    if rows <= sublane:
        # Single tiny block; a full-extent second-to-last dim is always legal.
        return rows

    max_rows = (target_bytes // max(1, hidden * itemsize)) // sublane * sublane
    max_rows = max(sublane, min(max_rows, 8192))

    nblocks = _cdiv(rows, min(max_rows, _round_up(rows, sublane)))
    # At least 2 blocks so the "parallel" axis shards across v7x's 2 TCs;
    # keep small grids even so neither core gets ~2x the work.
    nblocks = max(nblocks, 2)
    if nblocks < 8 and nblocks % 2 == 1:
        nblocks += 1

    block_rows = _round_up(_cdiv(rows, nblocks), sublane)
    return max(sublane, min(block_rows, _round_up(rows, sublane)))


def layernorm_pallas(x, alpha, beta, eps=1e-4):
    """x: (B, L, H); alpha, beta: (1, 1, H). Returns (B, L, H)."""
    B, L, H = x.shape
    assert H > 1, "LayerNorm with hidden_size == 1 is degenerate (torch.std -> NaN)"
    rows = B * L
    itemsize = jnp.dtype(x.dtype).itemsize

    x2 = x.reshape(rows, H)
    # Pre-cast params to f32 once here instead of per-block inside the kernel.
    a2 = alpha.reshape(1, H).astype(jnp.float32)
    b2 = beta.reshape(1, H).astype(jnp.float32)

    # Generation-aware budgets: v5e/v6e have 128 MiB VMEM, v7x has 64 MiB/TC.
    big_vmem = _vmem_capacity_bytes() >= 100 * 2**20
    target_bytes = (8 if big_vmem else 4) * 2**20
    vmem_cap = (96 if big_vmem else 48) * 2**20

    block_rows = _pick_block_rows(rows, H, itemsize, target_bytes)
    grid = (pl.cdiv(rows, block_rows),)  # ragged last block handled by Pallas

    # VMEM estimate: double-buffered in + out blocks (native dtype) plus ~3
    # full-tile f32 intermediates, plus headroom; clamped to the per-gen cap.
    block_elems = block_rows * H
    vmem_est = 4 * block_elems * itemsize + 3 * block_elems * 4 + (4 << 20)
    vmem_limit = int(min(vmem_cap, max(32 << 20, vmem_est)))

    kernel = functools.partial(_layernorm_kernel, eps=eps, hidden=H)

    cost = pl.CostEstimate(
        flops=8 * rows * H,
        transcendentals=rows,  # one sqrt per row
        bytes_accessed=2 * rows * H * itemsize + 2 * H * 4,
    )

    out2 = pl.pallas_call(
        kernel,
        out_shape=jax.ShapeDtypeStruct((rows, H), x.dtype),
        grid_spec=pltpu.PrefetchScalarGridSpec(
            num_scalar_prefetch=0,
            grid=grid,
            in_specs=[
                pl.BlockSpec((block_rows, H), lambda i: (i, 0)),
                pl.BlockSpec((1, H), lambda i: (0, 0)),  # constant index: no re-DMA
                pl.BlockSpec((1, H), lambda i: (0, 0)),
            ],
            out_specs=pl.BlockSpec((block_rows, H), lambda i: (i, 0)),
        ),
        compiler_params=pltpu.CompilerParams(
            dimension_semantics=("parallel",),
            vmem_limit_bytes=vmem_limit,
        ),
        cost_estimate=cost,
    )(x2, a2, b2)

    return out2.reshape(B, L, H)


def layernorm_ref(x, alpha, beta, eps=1e-4):
    # Pure-JAX reference matching the PyTorch forward (unbiased std).
    xf = x.astype(jnp.float32)
    mu = jnp.mean(xf, axis=2, keepdims=True)
    var = jnp.sum((xf - mu) ** 2, axis=2, keepdims=True) / (x.shape[2] - 1)
    sigma = jnp.sqrt(var)
    return ((xf - mu) / (sigma + eps) * alpha + beta).astype(x.dtype)


if __name__ == "__main__":
    key = jax.random.PRNGKey(0)

    batch, seq, hidden = 2, 8, 32
    x = jax.random.normal(key, (batch, seq, hidden), dtype=jnp.float32)

    # Deterministic parameter init (same as nn.Parameter ones/zeros).
    alpha = jnp.ones((1, 1, hidden), dtype=jnp.float32)
    beta = jnp.zeros((1, 1, hidden), dtype=jnp.float32)
    eps = 1e-4

    out = layernorm_pallas(x, alpha, beta, eps)
    out = jax.block_until_ready(out)

    ref = layernorm_ref(x, alpha, beta, eps)
    assert out.shape == x.shape
    assert jnp.allclose(out, ref, atol=1e-5, rtol=1e-5), "mismatch vs reference"

    print("KERNEL_OK")
</pallas_src>

<mosaic_0001>
module attributes {stable_mosaic.version = 11 : i64} {
  func.func @_layernorm_kernel(%arg0: i32, %arg1: memref<8x32xf32, #tpu.memory_space<vmem>>, %arg2: memref<1x32xf32, #tpu.memory_space<vmem>>, %arg3: memref<1x32xf32, #tpu.memory_space<vmem>>, %arg4: memref<8x32xf32, #tpu.memory_space<vmem>>) attributes {dimension_semantics = [#tpu.dimension_semantics<parallel>], iteration_bounds = array<i64: 2>, scalar_prefetch = 0 : i64, scratch_operands = 0 : i64, tpu.core_type = #tpu.core_type<tc>, window_params = [{transform_indices = @transform_0, window_bounds = array<i64: 8, 32>}, {pipeline_mode = #tpu.pipeline_mode<synchronous>, transform_indices = @transform_1, window_bounds = array<i64: 1, 32>}, {pipeline_mode = #tpu.pipeline_mode<synchronous>, transform_indices = @transform_2, window_bounds = array<i64: 1, 32>}, {transform_indices = @transform_3, window_bounds = array<i64: 8, 32>}]} {
    %c0 = arith.constant 0 : index
    %c0_0 = arith.constant 0 : index
    %0 = vector.load %arg1[%c0, %c0_0] : memref<8x32xf32, #tpu.memory_space<vmem>>, vector<8x32xf32>
    %cst = arith.constant dense<0.000000e+00> : vector<8xf32>
    %1 = vector.multi_reduction <add>, %0, %cst [1] : vector<8x32xf32> to vector<8xf32>
    %2 = vector.shape_cast %1 : vector<8xf32> to vector<8x1xf32>
    %3 = arith.mulf %0, %0 : vector<8x32xf32>
    %cst_1 = arith.constant dense<0.000000e+00> : vector<8xf32>
    %4 = vector.multi_reduction <add>, %3, %cst_1 [1] : vector<8x32xf32> to vector<8xf32>
    %5 = vector.shape_cast %4 : vector<8xf32> to vector<8x1xf32>
    %cst_2 = arith.constant 3.125000e-02 : f32
    %6 = vector.broadcast %cst_2 : f32 to vector<8x1xf32>
    %7 = arith.mulf %2, %6 : vector<8x1xf32>
    %8 = arith.mulf %2, %7 : vector<8x1xf32>
    %9 = arith.subf %5, %8 : vector<8x1xf32>
    %cst_3 = arith.constant 0.000000e+00 : f32
    %10 = vector.broadcast %cst_3 : f32 to vector<8x1xf32>
    %11 = arith.maximumf %9, %10 : vector<8x1xf32>
    %cst_4 = arith.constant 0.0322580636 : f32
    %12 = vector.broadcast %cst_4 : f32 to vector<8x1xf32>
    %13 = arith.mulf %11, %12 : vector<8x1xf32>
    %14 = math.sqrt %13 : vector<8x1xf32>
    %cst_5 = arith.constant 9.99999974E-5 : f32
    %15 = vector.broadcast %cst_5 : f32 to vector<8x1xf32>
    %16 = arith.addf %14, %15 : vector<8x1xf32>
    %cst_6 = arith.constant 1.000000e+00 : f32
    %17 = vector.broadcast %cst_6 : f32 to vector<8x1xf32>
    %18 = arith.divf %17, %16 : vector<8x1xf32>
    %19 = vector.broadcast %7 : vector<8x1xf32> to vector<8x32xf32>
    %20 = arith.subf %0, %19 : vector<8x32xf32>
    %21 = vector.broadcast %18 : vector<8x1xf32> to vector<8x32xf32>
    %22 = arith.mulf %20, %21 : vector<8x32xf32>
    %c0_7 = arith.constant 0 : index
    %c0_8 = arith.constant 0 : index
    %23 = vector.load %arg2[%c0_7, %c0_8] : memref<1x32xf32, #tpu.memory_space<vmem>>, vector<1x32xf32>
    %24 = vector.broadcast %23 : vector<1x32xf32> to vector<8x32xf32>
    %25 = arith.mulf %22, %24 : vector<8x32xf32>
    %c0_9 = arith.constant 0 : index
    %c0_10 = arith.constant 0 : index
    %26 = vector.load %arg3[%c0_9, %c0_10] : memref<1x32xf32, #tpu.memory_space<vmem>>, vector<1x32xf32>
    %27 = vector.broadcast %26 : vector<1x32xf32> to vector<8x32xf32>
    %28 = arith.addf %25, %27 : vector<8x32xf32>
    %c0_11 = arith.constant 0 : index
    %c0_12 = arith.constant 0 : index
    %29 = vector.load %arg4[%c0_11, %c0_12] : memref<8x32xf32, #tpu.memory_space<vmem>>, vector<8x32xf32>
    tpu.vector_store %arg4[%c0_11, %c0_12], %28 {strides = array<i32>} : memref<8x32xf32, #tpu.memory_space<vmem>>, vector<8x32xf32>,
    return
  }
  func.func @transform_0(%arg0: i32) -> (i32, i32) {
    %c0_i32 = arith.constant 0 : i32
    %c0_i32_0 = arith.constant 0 : i32
    return %arg0, %c0_i32 : i32, i32
  }
  func.func @transform_1(%arg0: i32) -> (i32, i32) {
    %c0_i32 = arith.constant 0 : i32
    %c0_i32_0 = arith.constant 0 : i32
    %c0_i32_1 = arith.constant 0 : i32
    return %c0_i32, %c0_i32_0 : i32, i32
  }
  func.func @transform_2(%arg0: i32) -> (i32, i32) {
    %c0_i32 = arith.constant 0 : i32
    %c0_i32_0 = arith.constant 0 : i32
    %c0_i32_1 = arith.constant 0 : i32
    return %c0_i32, %c0_i32_0 : i32, i32
  }
  func.func @transform_3(%arg0: i32) -> (i32, i32) {
    %c0_i32 = arith.constant 0 : i32
    %c0_i32_0 = arith.constant 0 : i32
    return %arg0, %c0_i32 : i32, i32
  }
}

</mosaic_0001>

<bundles_post_ra>
// kernel: tpu_custom_call.1
= control target key start
LH: loop header
LB: loop body
LE: loop exit
PB: predicated region body
PF: predicated region fallthrough
CT: control target
= control target key end

     0   :  { %8 = vsyncpa [#allocation3], 0  ;;  %s647_s0 = inlined_call_operand.hbm [shape: f32[16,32], index: 0, kind: input, shape index: {}]   ;;  %s648_s1 = inlined_call_operand.vmem [shape: f32[1,32], index: 1, kind: input, shape index: {}]   ;;  %s649_s2 = inlined_call_operand.vmem [shape: f32[1,32], index: 2, kind: input, shape index: {}]   ;;  %s650_s3 = inlined_call_operand.hbm [shape: f32[16,32], index: 3, kind: output, shape index: {}]  }
   0x1   :  { %10 = vsyncpa [#allocation3 + $0x1], 0 }
   0x2   :  { %11 = vsyncpa [#allocation4], 0 }
   0x3   :  { %13 = vsyncpa [#allocation4 + $0x1], 0  ;;  %s493_s12 = smov 0   ;;  %s495_s13 = smov 0  }
   0x4   :  { %s497_s14 = smov 0   ;;  %s499_s15 = smov 0  }
   0x5 LB: > { %s514_s16 = sadd.s32 4294967295, %s469_s15   ;;  %s313_s17 = sadd.s32 4294967294, %s469_s15   ;;  %s469_s15 = sphi %s499_s15, %s667_s15   ;;  %s465_s14 = sphi %s497_s14, %s666_s14   ;;  %s461_s13 = sphi %s495_s13, %s665_s13   ;;  %s457_s12 = sphi %s493_s12, %s664_s12  }
   0x6   : > { %s518_s18 = sadd.s32 1, %s469_s15   ;;  %s26_s19 = sadd.s32 1, %s465_s14 }
   0x7   : > { %s23_s20 = ssub.s32 %s469_s15, %s518_s18  ;;  %p33_p0 = scmp.ne.s32.totalorder %s465_s14, %s461_s13 }
   0x8   : > { %p24_p1 = scmp.eq.s32.totalorder %s23_s20, 0  ;;  %p34_p2 = scmp.eq.s32.totalorder %s469_s15, 0 }
   0x9   : > { %p39_p3 = scmp.ne.s32.totalorder %s461_s13, %s457_s12  ;;  %p40_p4 = scmp.eq.s32.totalorder %s514_s16, 0 }
   0xa   : > { %s530_s21 = scalar_select %p24_p1, %s465_s14, %s26_s19  }
   0xb   : > { %p532_p5 = por %p34_p2, %p33_p0  ;;  %p536_p6 = por %p40_p4, %p39_p3 }
   0xc   : > { %p105_p7 = scmp.eq.s32.totalorder %s514_s16, 1  ;;  %p111_p8 = scmp.eq.s32.totalorder %s313_s17, 1 }
   0xd   : > { %s654_s23 = scalar_select %p536_p6, 1, 0 }
   0xe   : > { %p339_p10 = scmp.lt.s32.totalorder %s469_s15, 2  ;;  %p543_p11 = por %p105_p7, %p33_p0 }
   0xf   : > { %p547_p12 = por %p111_p8, %p39_p3  ;;  %s137_s26 = sand.u32 1, %s465_s14  }
  0x10   : > { %s655_s24 = scalar_select %p543_p11, 1, 0 }
  0x11   : > { %s656_s25 = scalar_select %p547_p12, 1, 0 }
  0x12   : > { %s317_s27 = sshll.u32 %s469_s15, 7  ;;  %s316_s28 = sshll.u32 %s137_s26, 3 }
  0x13   : > { %s556_s4 = scalar_lea.hbm %s647_s0, %s317_s27  ;;  %s141_s5 = scalar_lea.vmem [#allocation2], %s316_s28 }
  0x14   : > { %s148_s6 = sshll.u32 %s141_s5, 4  ;;  %p560_p13 = pnand %p339_p10, %p532_p5  ;;  %s564_s6 = int_to_ptr.vmem [resolvable:$true] %s148_s6 }
  0x15   : > { %s138_s8 = scalar_lea.sflag [#allocation3], %s137_s26  ;;  %s377_s9 = scalar_lea.hbm %s556_s4, 128 }
  0x16   : > { %p378_p2 = scmp.ne.s32.totalorder %s556_s4, %s377_s9  ;;  %p379_p3 = pneg %p560_p13 }
  0x17   : > { %s382_s17 = scalar_lea.hbm %s647_s0, 256  ;;  %p383_p5 = scmp.lt.s32.totalorder %s556_s4, %s647_s0 }
  0x18   : > { %p380_p4 = pnand %p379_p3, %p378_p2  ;;  %p384_p8 = scmp.lt.s32.totalorder %s382_s17, %s377_s9 }
  0x1a   : > { %p381_p7 = pneg %p380_p4  ;;  %p385_p10 = por %p384_p8, %p383_p5 }
  0x1c   : > { %p386_p9 = pnand %p385_p10, %p381_p7 }
  0x1e   : > { %389 = shalt.err (!%p386_p9)
}
  0x1f   : > { %s390_s22 = scalar_lea.vmem %s564_s6, 128  ;;  %s471_s26 = smov [#allocation2]  }
  0x20   : > { %p391_p0 = scmp.ne.s32.totalorder %s564_s6, %s390_s22  ;;  %s395_s27 = sshll.u32 %s471_s26, 4  ;;  %s396_s27 = int_to_ptr.vmem [resolvable:$false] %s395_s27 }
  0x21   : > { %s397_s28 = scalar_lea.vmem %s396_s27, 256  ;;  %p398_p4 = scmp.lt.s32.totalorder %s564_s6, %s396_s27 }
  0x22   : > { %p393_p1 = pnand %p391_p0, %p379_p3  ;;  %p399_p12 = scmp.lt.s32.totalorder %s397_s28, %s390_s22 }
  0x24   : > { %p394_p2 = pneg %p393_p1  ;;  %p400_p11 = por %p399_p12, %p398_p4 }
  0x26   : > { %p401_p6 = pnand %p400_p11, %p394_p2 }
  0x28   : > { %404 = shalt.err (!%p401_p6)
}
  0x29   : > { %334 = dma.hbm_to_vmem [thread:$0]  (!%p560_p13), %s556_s4, 128, %s564_s6, %s138_s8  }
  0x2a   : > { %p658_p9 = scmp.lt.s32.totalorder %s469_s15, 3  ;;  %p659_p7 = scmp.ge.s32.totalorder %s469_s15, 1 }
  0x2c   : > { %p154_p0 = pnand %p659_p7, %p658_p9 }
  0x2d   : > { %s591_s29 = sand.u32 (!%p154_p0), 1, %s461_s13   ;;  %p660_p6 = scmp.ne.s32.totalorder (!%p154_p0), %s654_s23, 0 }
  0x2e   : > { %157 = sbr.rel (%p154_p0) target bundleno = 255 (0xff), region = 32  ;;  %s319_s30 = sshll.u32 (!%p154_p0), %s591_s29, 3 }
  0x2f   : > { %s160_s5 = scalar_lea.sflag (!%p154_p0), [#allocation3], %s591_s29  ;;  %s163_s7 = scalar_lea.vmem (!%p154_p0), [#allocation2], %s319_s30 }
  0x33   : > { %448 = dma.done.wait (%p660_p6), %s160_s5, 128  }
  0x34   : > { %450 = vsyncadd (%p660_p6), %s160_s5, 4294967168  ;;  %vm187_vm0 = vcmask 261120   ;;  %v186_v0 = vld [vmem:[%s163_s7] sm:$0xff]  ;;  %s324_s9 = sshll.u32 %s514_s16, 7  ;;  %s185_s10 = scalar_lea.vmem [#allocation5], %s319_s30 }
  0x35   : > { %v188_v1 = vsel %vm187_vm0, %v186_v0, 0.0  ;;  %v191_v2 = vmul.f32 %v186_v0, %v186_v0  ;;  %v321_v19 = vld [vmem:[%s648_s1] ss:$0 sm:$0xff]  ;;  %s243_s11 = sshll.u32 %s185_s10, 4  ;;  %s241_s20 = scalar_lea.hbm %s650_s3, %s324_s9  ;;  %s244_s11 = int_to_ptr.vmem [resolvable:$true] %s243_s11 }
  0x36   : > { %189 = vadd.xlane.f32.xlu0 %v188_v1  ;;  %v322_v21 = vld [vmem:[%s649_s2] ss:$0 sm:$0xff]  ;;  %s230_s22 = scalar_lea.sflag [#allocation4], %s591_s29  ;;  %s405_s26 = scalar_lea.vmem %s244_s11, 128 }
  0x37   : > { %v192_v3 = vsel %vm187_vm0, %v191_v2, 0.0  ;;  %p406_p11 = scmp.ne.s32.totalorder %s244_s11, %s405_s26  ;;  %p661_p12 = scmp.ne.s32.totalorder %s655_s24, 0 }
  0x38   : > { %s472_s27 = smov [#allocation5]  }
  0x39   : > { %p407_p13 = pnand %p406_p11, %p661_p12  ;;  %s409_s16 = sshll.u32 %s472_s27, 4  ;;  %s410_s16 = int_to_ptr.vmem [resolvable:$false] %s409_s16 }
  0x3a   : > { %193 = vadd.xlane.f32.xlu0 %v192_v3  ;;  %s411_s28 = scalar_lea.vmem %s410_s16, 256  ;;  %p412_p3 = scmp.lt.s32.totalorder %s244_s11, %s410_s16 }
  0x3b   : > { %p408_p1 = pneg %p407_p13  ;;  %p413_p5 = scmp.lt.s32.totalorder %s411_s28, %s405_s26 }
  0x3d   : > { %p414_p8 = por %p413_p5, %p412_p3 }
  0x3f   : > { %p415_p10 = pnand %p414_p8, %p408_p1 }
  0xbf   : > { %v190_v4 = vpop.xlane.xlu0 %189 }
  0xc0   : > { %v195_v5 = vmul.f32 0.03125, %v190_v4 }
  0xc2   : > { %v196_v6 = vmul.f32 %v195_v5, %v190_v4  ;;  %v210_v17 = vsub.f32 %v186_v0, %v195_v5 }
  0xc3   : > { %v194_v7 = vpop.xlane.xlu0 %193 }
  0xc4   : > { %v197_v8 = vsub.f32 %v194_v7, %v196_v6 }
  0xc6   : > { %v198_v9 = vmax.f32 %v197_v8, 0.0 }
  0xc8   : > { %v199_v10 = vmul.f32 0.032258064, %v198_v9 }
  0xca   : > { %373 = vrsqrt.f32 %v199_v10  ;;  %vm202_vm1 = vcmp.eq.f32.partialorder %v199_v10, inf  ;;  %v205_v13 = vand.u32 2147483648, %v199_v10  ;;  %vm204_vm2 = vcmp.eq.f32.partialorder %v199_v10, 0.0 }
  0xd7   : > { %v374_v11 = vpop.eup %373 }
  0xd8   : > { %v201_v12 = vmul.f32 %v374_v11, %v199_v10 }
  0xda   : > { %v203_v14 = vsel %vm202_vm1, %v199_v10, %v201_v12 }
  0xdb   : > { %v206_v15 = vsel %vm204_vm2, %v205_v13, %v203_v14 }
  0xdc   : > { %v207_v16 = vadd.f32 0.0001, %v206_v15 }
  0xde   : > { %375 = vrcp.f32 %v207_v16 }
  0xeb   : > { %v376_v18 = vpop.eup %375 }
  0xec   : > { %v211_v20 = vmul.f32 %v376_v18, %v210_v17 }
  0xee   : > { %v219_v22 = vmul.f32 %v321_v19, %v211_v20 }
  0xf0   : > { %v227_v23 = vadd.f32 %v322_v21, %v219_v22 }
  0xf2   : > { %228 = vst.msk [vmem:[%s185_s10] sm:$0xff] %vm187_vm0, %v227_v23 }
  0xf3   : > { %418 = shalt.err (!%p415_p10)
}
  0xf4   : > { %s419_s30 = scalar_lea.hbm %s241_s20, 128  ;;  %s423_s7 = scalar_lea.hbm %s650_s3, 256 }
  0xf5   : > { %p420_p2 = scmp.ne.s32.totalorder %s241_s20, %s419_s30  ;;  %p424_p7 = scmp.lt.s32.totalorder %s241_s20, %s650_s3 }
  0xf6   : > { %p425_p0 = scmp.lt.s32.totalorder %s423_s7, %s419_s30 }
  0xf7   : > { %p421_p4 = pnand %p420_p2, %p661_p12 }
  0xf8   : > { %p426_p6 = por %p425_p0, %p424_p7 }
  0xf9   : > { %p422_p9 = pneg %p421_p4 }
  0xfb   : > { %p427_p11 = pnand %p426_p6, %p422_p9 }
  0xfd   : > { %430 = shalt.err (!%p427_p11)
}
  0xfe   : > { %329 = dma.vmem_to_hbm [thread:$0]  (%p661_p12), %s244_s11, 128, %s241_s20, %s230_s22  }
  0xff PF: > { %s255_s6 = sand.u32 1, %s457_s12   ;;  %p662_p13 = scmp.ne.s32.totalorder %s656_s25, 0 }
 0x100   : > { %p663_p1 = scmp.ge.s32.totalorder %s469_s15, 2  ;;  %s256_s8 = scalar_lea.sflag [#allocation4], %s255_s6 }
 0x102   : > { %p336_p3 = pnand %p663_p1, %p662_p13 }
 0x104   : > { %p337_p5 = pneg %p336_p3 }
 0x106   : > { %452 = dma.done.wait (%p337_p5), %s256_s8, 128  }
 0x107   : > { %454 = vsyncadd (%p337_p5), %s256_s8, 4294967168  ;;  %p16_p8 = scmp.ge.s32.totalorder %s518_s18, 4   ;;  %s664_s12 = smov %s461_s13 }
 0x108   : > { %s665_s13 = smov %s465_s14  ;;  %s666_s14 = smov %s530_s21 }
 0x109   : > { %s667_s15 = smov %s518_s18  ;;  %18 = sbr.rel (!%p16_p8) target bundleno = 5 (0x5), region = 77 }
 0x10e   :  { %261 = vsyncpa [#allocation3], 1 }
 0x10f   :  { %263 = vsyncpa [#allocation3 + $0x1], 1 }
 0x110   :  { %264 = vsyncpa [#allocation4], 1 }
 0x111   :  { %266 = vsyncpa [#allocation4 + $0x1], 1 }

</bundles_post_ra>
